<compile_context>
chip_gen: v7x
topology: tpu7x:2x2x1
jax: 0.10.0
libtpu: 0.0.40
codegen_flags: <defaults>
</compile_context>

<pallas_src>
import functools

import jax
import jax.numpy as jnp
from jax.experimental import pallas as pl
from jax.experimental.pallas import tpu as pltpu

NUM_BLOCKS = 4
ALPHA = 0.1


def _round_up(v, m):
    return -(-v // m) * m


def mapping_kernel(x_ref, w_ref, b_ref, o_ref, acc_ref, *,
                   row_chunk, compute_dtype):
    """One (batch_tile, layer) grid step of the Mapping forward.

    Grid = (n_batch_tiles, num_layers); layer axis is innermost ("arbitrary").
      x_ref:   (tile_b, D)  input batch tile (only read at layer 0)
      w_ref:   (1, D, D)    this layer's (pre-transposed) weight
      b_ref:   (1, 1, D)    this layer's bias
      o_ref:   (tile_b, D)  output tile (only written at the last layer)
      acc_ref: (tile_b, D)  f32 activation carried across the layer axis
    """
    layer = pl.program_id(1)

    @pl.when(layer == 0)
    def _():
        acc_ref[...] = x_ref[...].astype(jnp.float32)

    # Hoisted once per grid step (NOT per row chunk): weight cast + bias bcast.
    w = w_ref[0].astype(compute_dtype)         # (D, D)
    bias = b_ref[0].astype(jnp.float32)        # (1, D) -> broadcasts over rows

    tile_rows = acc_ref.shape[0]
    n_chunks = tile_rows // row_chunk

    def one_chunk(x):
        h = jnp.dot(x.astype(compute_dtype), w,
                    preferred_element_type=jnp.float32)   # f32 accumulation
        h = h + bias
        # TODO(synk): bf16 tanh on v6e/v7x (bf16 EUP) for D_pad <= 256;
        # kept f32 because v5e has no bf16 EUP and for accuracy headroom.
        return x + ALPHA * jnp.tanh(h)

    if n_chunks <= 1:
        acc_ref[...] = one_chunk(acc_ref[...])
    else:
        # Sub-chunk rows so the live f32 activation stays bounded by
        # row_chunk * D * 4 bytes; >=2 chunks lets the scheduler overlap
        # chunk c's tanh (EUP) with chunk c+1's matmul (MXU).
        def body(c, carry):
            r = pl.multiple_of(c * row_chunk, row_chunk)
            acc_ref[pl.ds(r, row_chunk), :] = one_chunk(
                acc_ref[pl.ds(r, row_chunk), :])
            return carry

        jax.lax.fori_loop(0, n_chunks, body, 0, unroll=(n_chunks <= 8))

    @pl.when(layer == pl.num_programs(1) - 1)
    def _():
        o_ref[...] = acc_ref[...].astype(o_ref.dtype)


def _vmem_cap_bytes():
    """~80% of physical VMEM per core (51 MiB v7x, ~102 MiB v5e/v6e)."""
    try:
        info = pltpu.get_tpu_info()
        cap = int(0.8 * getattr(info, "vmem_capacity_bytes", 64 << 20))
    except Exception:
        cap = 48 << 20
    return max(32 << 20, cap)


@functools.partial(jax.jit, static_argnames=("tile_b", "compute_dtype"))
def mapping_forward(x, w, b, *, tile_b=None, compute_dtype=jnp.bfloat16):
    """x: (B, dim); w: (num, dim, dim) [pre-transposed]; b: (num, 1, dim)."""
    B, D = x.shape
    num = w.shape[0]

    # --- lane-dense feature dim (exact zero padding) -------------------------
    D_pad = _round_up(D, 128)

    # --- balanced batch tiles -------------------------------------------------
    if tile_b is None:
        n_tiles = max(1, -(-B // 512))
        if B > 256 and n_tiles < 2:
            n_tiles = 2          # keep >=2 "parallel" steps for v7x's 2 TCs
        tile_b = _round_up(-(-B // n_tiles), 8)
    else:
        tile_b = min(_round_up(tile_b, 8), _round_up(B, 8))

    # Row sub-chunking: keep the live f32 chunk around <=512 KiB, multiple of 8.
    row_chunk = max(8, min(256, ((512 * 1024) // (D_pad * 4)) // 8 * 8))
    if tile_b <= row_chunk:
        row_chunk = tile_b
    else:
        tile_b = _round_up(tile_b, row_chunk)

    # --- VMEM budget (weights streamed per layer, so only 2 W buffers) -------
    vmem_cap = _vmem_cap_bytes()
    w_itemsize = jnp.dtype(compute_dtype).itemsize
    x_itemsize = jnp.dtype(x.dtype).itemsize

    def _vmem_estimate(tb):
        return int(1.3 * (2 * D_pad * D_pad * w_itemsize      # W double-buffer
                          + 2 * D_pad * 4                     # bias buffers
                          + 4 * tb * D_pad * x_itemsize       # x + out buffers
                          + tb * D_pad * 4)) + (4 << 20)      # acc scratch

    while _vmem_estimate(tile_b) > vmem_cap and tile_b > row_chunk:
        tile_b = max(row_chunk, _round_up(tile_b // 2, row_chunk))

    n_tiles = -(-B // tile_b)
    B_pad = n_tiles * tile_b
    vmem_limit = min(vmem_cap, max(32 << 20, _vmem_estimate(tile_b)))

    # --- padding --------------------------------------------------------------
    if D_pad != D:
        x = jnp.pad(x, ((0, 0), (0, D_pad - D)))
        w = jnp.pad(w, ((0, 0), (0, D_pad - D), (0, D_pad - D)))
        b = jnp.pad(b, ((0, 0), (0, 0), (0, D_pad - D)))
    if B_pad != B:
        # TODO(synk): in-kernel masking of the ragged last tile would avoid
        # this extra HBM pass when D is already lane-dense.
        x = jnp.pad(x, ((0, B_pad - B), (0, 0)))

    if compute_dtype != jnp.float32:
        w = w.astype(compute_dtype)   # halves weight VMEM + DMA bytes

    grid = (B_pad // tile_b, num)

    kernel = functools.partial(mapping_kernel, row_chunk=row_chunk,
                               compute_dtype=compute_dtype)

    out = pl.pallas_call(
        kernel,
        out_shape=jax.ShapeDtypeStruct((B_pad, D_pad), x.dtype),
        grid_spec=pltpu.PrefetchScalarGridSpec(
            num_scalar_prefetch=0,
            grid=grid,
            in_specs=[
                pl.BlockSpec((tile_b, D_pad), lambda i, l: (i, 0)),       # x
                pl.BlockSpec((1, D_pad, D_pad), lambda i, l: (l, 0, 0)),  # W_l
                pl.BlockSpec((1, 1, D_pad), lambda i, l: (l, 0, 0)),      # b_l
            ],
            out_specs=pl.BlockSpec((tile_b, D_pad), lambda i, l: (i, 0)),
            scratch_shapes=[pltpu.VMEM((tile_b, D_pad), jnp.float32)],
        ),
        compiler_params=pltpu.CompilerParams(
            dimension_semantics=("parallel", "arbitrary"),
            vmem_limit_bytes=vmem_limit),
    )(x, w, b)

    if B_pad == B and D_pad == D:
        return out
    return out[:B, :D]


def init_params(key, dim, num=NUM_BLOCKS):
    """Deterministic init mimicking nn.Linear's U(-1/sqrt(dim), 1/sqrt(dim))."""
    kw, kb = jax.random.split(key)
    bound = 1.0 / jnp.sqrt(jnp.float32(dim))
    # PyTorch Linear stores W as (out, in); we store its transpose directly
    # as (in, out) so the kernel does x @ W.
    w = jax.random.uniform(kw, (num, dim, dim), jnp.float32, -bound, bound)
    b = jax.random.uniform(kb, (num, 1, dim), jnp.float32, -bound, bound)
    return w, b


def mapping_reference(x, w, b):
    """Pure-JAX reference matching the PyTorch forward."""
    for i in range(w.shape[0]):
        x = x + ALPHA * jnp.tanh(x @ w[i] + b[i])
    return x


if __name__ == "__main__":
    root = jax.random.PRNGKey(0)
    kx, kp, kx2, kp2 = jax.random.split(root, 4)

    # Primary test: batch=16, hidden dim=32 (small shapes from the module spec).
    B, DIM = 16, 32
    x = jax.random.normal(kx, (B, DIM), jnp.float32)
    w, b = init_params(kp, DIM, NUM_BLOCKS)
    ref = mapping_reference(x, w, b)

    # f32 MXU-input path: tight tolerance.
    out_f32 = jax.block_until_ready(
        mapping_forward(x, w, b, compute_dtype=jnp.float32))
    assert out_f32.shape == (B, DIM)
    assert jnp.allclose(out_f32, ref, atol=1e-5, rtol=1e-5), "f32 mismatch"

    # Default bf16 matmul-input path (f32 accumulation / tanh / residual).
    out_bf16 = jax.block_until_ready(mapping_forward(x, w, b))
    assert out_bf16.shape == (B, DIM)
    assert jnp.allclose(out_bf16, ref, atol=3e-2, rtol=3e-2), "bf16 mismatch"

    # Ragged batch + non-128 dim: exercises tail / lane padding paths.
    B2, D2 = 13, 48
    x2 = jax.random.normal(kx2, (B2, D2), jnp.float32)
    w2, b2 = init_params(kp2, D2, NUM_BLOCKS)
    out2 = jax.block_until_ready(
        mapping_forward(x2, w2, b2, compute_dtype=jnp.float32))
    ref2 = mapping_reference(x2, w2, b2)
    assert out2.shape == (B2, D2)
    assert jnp.allclose(out2, ref2, atol=1e-4, rtol=1e-4), "ragged mismatch"

    print("KERNEL_OK")
</pallas_src>

<mosaic_0001>
module attributes {stable_mosaic.version = 11 : i64} {
  func.func @mapping_kernel(%arg0: i32, %arg1: i32, %arg2: memref<16x128xf32, #tpu.memory_space<vmem>>, %arg3: memref<1x128x128xf32, #tpu.memory_space<vmem>>, %arg4: memref<1x1x128xf32, #tpu.memory_space<vmem>>, %arg5: memref<16x128xf32, #tpu.memory_space<vmem>>, %arg6: memref<16x128xf32, #tpu.memory_space<vmem>>) attributes {dimension_semantics = [#tpu.dimension_semantics<parallel>, #tpu.dimension_semantics<arbitrary>], iteration_bounds = array<i64: 1, 4>, scalar_prefetch = 0 : i64, scratch_operands = 1 : i64, tpu.core_type = #tpu.core_type<tc>, window_params = [{transform_indices = @transform_0, window_bounds = array<i64: 16, 128>}, {transform_indices = @transform_1, window_bounds = array<i64: 1, 128, 128>}, {transform_indices = @transform_2, window_bounds = array<i64: 1, 1, 128>}, {transform_indices = @transform_3, window_bounds = array<i64: 16, 128>}]} {
    %c0_i32 = arith.constant 0 : i32
    %0 = arith.cmpi eq, %arg1, %c0_i32 : i32
    %1 = arith.extui %0 : i1 to i32
    %c0_i32_0 = arith.constant 0 : i32
    %2 = arith.cmpi ne, %1, %c0_i32_0 : i32
    scf.if %2 {
      %c0_12 = arith.constant 0 : index
      %c0_13 = arith.constant 0 : index
      %19 = vector.load %arg2[%c0_12, %c0_13] : memref<16x128xf32, #tpu.memory_space<vmem>>, vector<16x128xf32>
      %c0_14 = arith.constant 0 : index
      %c0_15 = arith.constant 0 : index
      %20 = vector.load %arg6[%c0_14, %c0_15] : memref<16x128xf32, #tpu.memory_space<vmem>>, vector<16x128xf32>
      tpu.vector_store %arg6[%c0_14, %c0_15], %19 {strides = array<i32>} : memref<16x128xf32, #tpu.memory_space<vmem>>, vector<16x128xf32>,
    } else {
    }
    %c0 = arith.constant 0 : index
    %c0_1 = arith.constant 0 : index
    %c0_2 = arith.constant 0 : index
    %3 = vector.load %arg3[%c0, %c0_1, %c0_2] : memref<1x128x128xf32, #tpu.memory_space<vmem>>, vector<1x128x128xf32>
    %4 = vector.shape_cast %3 : vector<1x128x128xf32> to vector<128x128xf32>
    %c0_3 = arith.constant 0 : index
    %c0_4 = arith.constant 0 : index
    %c0_5 = arith.constant 0 : index
    %5 = vector.load %arg4[%c0_3, %c0_4, %c0_5] : memref<1x1x128xf32, #tpu.memory_space<vmem>>, vector<1x1x128xf32>
    %6 = vector.shape_cast %5 : vector<1x1x128xf32> to vector<1x128xf32>
    %c0_6 = arith.constant 0 : index
    %c0_7 = arith.constant 0 : index
    %7 = vector.load %arg6[%c0_6, %c0_7] : memref<16x128xf32, #tpu.memory_space<vmem>>, vector<16x128xf32>
    %cst = arith.constant dense<0.000000e+00> : vector<16x128xf32>
    %8 = tpu.matmul %7, %4, %cst {dimension_numbers = #tpu.dot_dimension_numbers<[1], [0], [0], [1], [0, 0, 1, 1], [], []>} : vector<16x128xf32>, vector<128x128xf32>, vector<16x128xf32> -> vector<16x128xf32>
    %9 = vector.broadcast %6 : vector<1x128xf32> to vector<16x128xf32>
    %10 = arith.addf %8, %9 : vector<16x128xf32>
    %11 = math.tanh %10 : vector<16x128xf32>
    %cst_8 = arith.constant 1.000000e-01 : f32
    %12 = vector.broadcast %cst_8 : f32 to vector<16x128xf32>
    %13 = arith.mulf %12, %11 : vector<16x128xf32>
    %14 = arith.addf %7, %13 : vector<16x128xf32>
    %c0_9 = arith.constant 0 : index
    %c0_10 = arith.constant 0 : index
    %15 = vector.load %arg6[%c0_9, %c0_10] : memref<16x128xf32, #tpu.memory_space<vmem>>, vector<16x128xf32>
    tpu.vector_store %arg6[%c0_9, %c0_10], %14 {strides = array<i32>} : memref<16x128xf32, #tpu.memory_space<vmem>>, vector<16x128xf32>,
    %c3_i32 = arith.constant 3 : i32
    %16 = arith.cmpi eq, %arg1, %c3_i32 : i32
    %17 = arith.extui %16 : i1 to i32
    %c0_i32_11 = arith.constant 0 : i32
    %18 = arith.cmpi ne, %17, %c0_i32_11 : i32
    scf.if %18 {
      %c0_12 = arith.constant 0 : index
      %c0_13 = arith.constant 0 : index
      %19 = vector.load %arg6[%c0_12, %c0_13] : memref<16x128xf32, #tpu.memory_space<vmem>>, vector<16x128xf32>
      %c0_14 = arith.constant 0 : index
      %c0_15 = arith.constant 0 : index
      %20 = vector.load %arg5[%c0_14, %c0_15] : memref<16x128xf32, #tpu.memory_space<vmem>>, vector<16x128xf32>
      tpu.vector_store %arg5[%c0_14, %c0_15], %19 {strides = array<i32>} : memref<16x128xf32, #tpu.memory_space<vmem>>, vector<16x128xf32>,
    } else {
    }
    return
  }
  func.func @transform_0(%arg0: i32, %arg1: i32) -> (i32, i32) {
    %c0_i32 = arith.constant 0 : i32
    %c0_i32_0 = arith.constant 0 : i32
    return %arg0, %c0_i32 : i32, i32
  }
  func.func @transform_1(%arg0: i32, %arg1: i32) -> (i32, i32, i32) {
    %c0_i32 = arith.constant 0 : i32
    %c0_i32_0 = arith.constant 0 : i32
    %c0_i32_1 = arith.constant 0 : i32
    return %arg1, %c0_i32, %c0_i32_0 : i32, i32, i32
  }
  func.func @transform_2(%arg0: i32, %arg1: i32) -> (i32, i32, i32) {
    %c0_i32 = arith.constant 0 : i32
    %c0_i32_0 = arith.constant 0 : i32
    %c0_i32_1 = arith.constant 0 : i32
    return %arg1, %c0_i32, %c0_i32_0 : i32, i32, i32
  }
  func.func @transform_3(%arg0: i32, %arg1: i32) -> (i32, i32) {
    %c0_i32 = arith.constant 0 : i32
    %c0_i32_0 = arith.constant 0 : i32
    return %arg0, %c0_i32 : i32, i32
  }
}

</mosaic_0001>

<bundles_post_ra>
// kernel: mapping_forward.1
= control target key start
LH: loop header
LB: loop body
LE: loop exit
PB: predicated region body
PF: predicated region fallthrough
CT: control target
= control target key end

     0   :  { %8 = vsyncpa [#allocation4], 0  ;;  %s635_s12 = smov 0   ;;  %s637_s13 = smov 0   ;;  %s736_s0 = inlined_call_operand.vmem [shape: f32[16,128], index: 0, kind: input, shape index: {}]   ;;  %s737_s1 = inlined_call_operand.vmem [shape: f32[4,128,128], index: 1, kind: input, shape index: {}]   ;;  %s738_s2 = inlined_call_operand.vmem [shape: f32[4,1,128], index: 2, kind: input, shape index: {}]   ;;  %s739_s3 = inlined_call_operand.hbm [shape: f32[16,128], index: 3, kind: output, shape index: {}]  }
   0x1   :  { %s639_s14 = smov 0  }
   0x2 LB: > { %s421_s15 = sadd.s32 4294967295, %s610_s14   ;;  %s23_s16 = sadd.s32 1, %s606_s13  ;;  %s610_s14 = sphi %s639_s14, %s14_s14   ;;  %s606_s13 = sphi %s637_s13, %s742_s13   ;;  %s602_s12 = sphi %s635_s12, %s741_s12  }
   0x3   : > { %p24_p0 = scmp.ge.s32.totalorder %s23_s16, 4  ;;  %p425_p1 = scmp.ge.s32.totalorder %s610_s14, 1 }
   0x4   : > { %p169_p2 = scmp.lt.s32.totalorder %s610_s14, 5 }
   0x5   : > { %s744_s16 = smov (%p24_p0, %s23_s16), 0 }
   0x6   : > { %p170_p3 = pnand %p425_p1, %p169_p2 }
   0x7   : > { %p202_p4 = scmp.lt.s32.totalorder (!%p170_p3), %s602_s12, 3  ;;  %p428_p5 = scmp.ne.s32.totalorder (!%p170_p3), %s602_s12, 0 }
   0x8   : > { %173 = sbr.rel (%p170_p3) target bundleno = 323 (0x143), region = 32 }
   0xf   : > { %s658_s17 = scalar_select %p202_p4, %s602_s12, 3 }
  0x10   : > { %214 = sbr.rel (%p428_p5) target bundleno = 23 (0x17), region = 36  ;;  %v215_v0 = vld [vmem:[%s736_s0] sm:$0xff] (!%p428_p5)  ;;  %v216_v1 = vld [vmem:[%s736_s0 + $0x8] sm:$0xff] (!%p428_p5) }
  0x11   : > { %s435_s18 = sshll.u32 %s658_s17, 7  ;;  %s209_s21 = scalar_lea.vmem %s738_s2, %s658_s17  ;;  %217 = vst [vmem:[#allocation2] sm:$0xff] (!%p428_p5), %v215_v0  ;;  %218 = vst [vmem:[#allocation2 + $0x8] sm:$0xff] (!%p428_p5), %v216_v1 }
  0x12   : > { %s668_s24 = scalar_lea.vmem %s737_s1, %s435_s18 }
  0x17 PF: > { %v219_v2 = vld [vmem:[%s668_s24] sm:$0xff]  ;;  %v220_v3 = vld [vmem:[%s668_s24 + $0x8] sm:$0xff]  ;;  %v221_v4 = vld [vmem:[%s668_s24 + $0x10] sm:$0xff]  ;;  %p430_p6 = scmp.ne.s32.totalorder %s602_s12, 3 }
  0x18   : > { %v489_v5 = vpack.c.bf16 %v220_v3, %v219_v2  ;;  %v222_v6 = vld [vmem:[%s668_s24 + $0x18] sm:$0xff]  ;;  %v223_v8 = vld [vmem:[%s668_s24 + $0x20] sm:$0xff]  ;;  %v224_v9 = vld [vmem:[%s668_s24 + $0x28] sm:$0xff] }
  0x19   : > { %v493_v7 = vpack.c.bf16 %v222_v6, %v221_v4  ;;  %v497_v10 = vpack.c.bf16 %v224_v9, %v223_v8  ;;  %v236_v11 = vld [vmem:[#allocation2] sm:$0xff]  ;;  %v225_v12 = vld [vmem:[%s668_s24 + $0x30] sm:$0xff]  ;;  %v226_v13 = vld [vmem:[%s668_s24 + $0x38] sm:$0xff] }
  0x1a   : > { %490 = vmatprep.subr.bf16.mxu0 %v489_v5  ;;  %486 = vmatprep.mubr.f32.mxu0 %v236_v11  ;;  %v501_v14 = vpack.c.bf16 %v226_v13, %v225_v12  ;;  %v227_v15 = vld [vmem:[%s668_s24 + $0x40] sm:$0xff]  ;;  %v228_v16 = vld [vmem:[%s668_s24 + $0x48] sm:$0xff]  ;;  %v229_v18 = vld [vmem:[%s668_s24 + $0x50] sm:$0xff] }
  0x1b   : > { %492 = vmatpush3.bf16.msra.mxu0 %v489_v5  ;;  %v505_v17 = vpack.c.bf16 %v228_v16, %v227_v15  ;;  %v230_v19 = vld [vmem:[%s668_s24 + $0x58] sm:$0xff]  ;;  %v231_v21 = vld [vmem:[%s668_s24 + $0x60] sm:$0xff]  ;;  %v232_v22 = vld [vmem:[%s668_s24 + $0x68] sm:$0xff] }
  0x1c   : > { %494 = vmatprep.subr.bf16.mxu0 %v493_v7  ;;  %v509_v20 = vpack.c.bf16 %v230_v19, %v229_v18  ;;  %v513_v23 = vpack.c.bf16 %v232_v22, %v231_v21  ;;  %v233_v24 = vld [vmem:[%s668_s24 + $0x70] sm:$0xff]  ;;  %v234_v25 = vld [vmem:[%s668_s24 + $0x78] sm:$0xff]  ;;  %v237_v27 = vld [vmem:[#allocation2 + $0x8] sm:$0xff] }
  0x1d   : > { %v517_v26 = vpack.c.bf16 %v234_v25, %v233_v24  ;;  %v429_v28 = vld [vmem:[%s209_s21] ss:$0 sm:$0xff] }
  0x1f   : > { %496 = vmatpush3.bf16.msra.mxu0 %v493_v7 }
  0x20   : > { %498 = vmatprep.subr.bf16.mxu0 %v497_v10 }
  0x23   : > { %500 = vmatpush3.bf16.msra.mxu0 %v497_v10 }
  0x24   : > { %502 = vmatprep.subr.bf16.mxu0 %v501_v14 }
  0x27   : > { %504 = vmatpush3.bf16.msra.mxu0 %v501_v14 }
  0x28   : > { %506 = vmatprep.subr.bf16.mxu0 %v505_v17 }
  0x2b   : > { %508 = vmatpush3.bf16.msra.mxu0 %v505_v17 }
  0x2c   : > { %510 = vmatprep.subr.bf16.mxu0 %v509_v20 }
  0x2f   : > { %512 = vmatpush3.bf16.msra.mxu0 %v509_v20 }
  0x30   : > { %514 = vmatprep.subr.bf16.mxu0 %v513_v23 }
  0x33   : > { %516 = vmatpush3.bf16.msra.mxu0 %v513_v23 }
  0x34   : > { %518 = vmatprep.subr.bf16.mxu0 %v517_v26 }
  0x37   : > { %520 = vmatpush3.bf16.msra.mxu0 %v517_v26 }
  0x3a   : > { %487 = vmatmul.mubr.f32.vlgmr.msra.gmra.mrb[0].mxu0 %v237_v27 }
 0x10d   : > { %v488_v29 = vpop.f32.mrb[0].mxu0 }
 0x10e   : > { %v316_v30 = vadd.f32 %v488_v29, %v429_v28  ;;  %v310_v31 = vpop.f32.mrb[1].mxu0 }
 0x10f   : > { %v311_v32 = vadd.f32 %v429_v28, %v310_v31 }
 0x110   : > { %554 = vtanh.f32 %v316_v30 }
 0x111   : > { %556 = vtanh.f32 %v311_v32 }
 0x11a   : > { %v555_v33 = vpop.eup %554  ;;  %330 = sbr.rel (%p430_p6) target bundleno = 297 (0x129), region = 40 }
 0x11b   : > { %v557_v34 = vpop.eup %556  ;;  %v322_v35 = vmul.f32 0.1, %v555_v33 }
 0x11c   : > { %v321_v36 = vmul.f32 0.1, %v557_v34 }
 0x11d   : > { %v324_v37 = vadd.f32 %v322_v35, %v237_v27 }
 0x11e   : > { %v323_v38 = vadd.f32 %v321_v36, %v236_v11 }
 0x11f   : > { %326 = vst [vmem:[#allocation2 + $0x8] sm:$0xff] %v324_v37 }
 0x120   : > { %325 = vst [vmem:[#allocation2] sm:$0xff] %v323_v38 }
 0x126   : > { %v332_v40 = vld [vmem:[#allocation2 + $0x8] sm:$0xff] }
 0x127   : > { %v331_v39 = vld [vmem:[#allocation2] sm:$0xff]  ;;  %334 = vst [vmem:[#allocation3 + $0x8] sm:$0xff] %v332_v40 }
 0x128   : > { %333 = vst [vmem:[#allocation3] sm:$0xff] %v331_v39 }
 0x129 PF: > { %p701_p7 = scmp.eq.s32.totalorder %s421_s15, 3  ;;  %s612_s5 = smov [#allocation3]  }
 0x12a   : > { %s344_s6 = sshll.u32 %s612_s5, 4  ;;  %s345_s6 = int_to_ptr.vmem [resolvable:$true] %s344_s6 }
 0x12b   : > { %s558_s7 = scalar_lea.vmem %s345_s6, 256  ;;  %p565_p11 = scmp.lt.s32.totalorder %s345_s6, %s345_s6 }
 0x12c   : > { %p559_p8 = scmp.ne.s32.totalorder %s345_s6, %s558_s7  ;;  %p566_p12 = scmp.lt.s32.totalorder %s558_s7, %s558_s7 }
 0x12e   : > { %p560_p9 = pnand %p559_p8, %p701_p7  ;;  %p567_p13 = por %p566_p12, %p565_p11 }
 0x130   : > { %p561_p10 = pneg %p560_p9 }
 0x132   : > { %p568_p0 = pnand %p567_p13, %p561_p10 }
 0x134   : > { %571 = shalt.err (!%p568_p0)
}
 0x135   : > { %s572_s10 = scalar_lea.hbm %s739_s3, 256 }
 0x136   : > { %p573_p1 = scmp.ne.s32.totalorder %s739_s3, %s572_s10  ;;  %p578_p4 = scmp.lt.u32.totalorder %s572_s10, %s739_s3 }
 0x138   : > { %p574_p2 = pnand %p573_p1, %p701_p7 }
 0x13a   : > { %p575_p3 = pneg %p574_p2 }
 0x13c   : > { %p580_p5 = pnand %p578_p4, %p575_p3 }
 0x13e   : > { %583 = shalt.err (!%p580_p5)
}
 0x13f   : > { %s613_s18 = smov 128   ;;  %s614_s19 = smov 8  }
 0x140   : > { %522 = dma.vmem_to_hbm [thread:$0]  (%p701_p7), %s345_s6, 256, %s739_s3, [#allocation4], %s613_s18, %s613_s18, %s614_s19  }
 0x141   : > { %597 = dma.done.wait (%p701_p7), [#allocation4], 256  }
 0x142   : > { %599 = vsyncadd (%p701_p7), [#allocation4], 4294967040 }
 0x143 PF: > { %s14_s14 = sadd.s32 1, %s610_s14   ;;  %s741_s12 = smov %s606_s13 }
 0x144   : > { %p11_p6 = scmp.ge.s32.totalorder %s14_s14, 6   ;;  %s742_s13 = smov %s744_s16 }
 0x146   :  { %13 = sbr.rel (!%p11_p6) target bundleno = 2 (0x2), region = 74 }
 0x14d   :  { %360 = vsyncpa [#allocation4], 1 }
 0x14e   :  { %362 = vsyncpa [#allocation4 + $0x1], 1 }

</bundles_post_ra>
